<compile_context>
chip_gen: v7x
topology: tpu7x:2x2x1
jax: 0.10.0
libtpu: 0.0.40
codegen_flags: <defaults>
</compile_context>

<pallas_src>
import functools

import jax
import jax.numpy as jnp
from jax.experimental import pallas as pl
from jax.experimental.pallas import tpu as pltpu


def _inverse_model_kernel(x_ref, w_ref, b_ref, out_ref, *, batch, o_pad):
    # x_ref : (T*B, E)       flattened obs encoding, rows t-major (r = t*B + b)
    # w_ref : (E, 2*O_pad)   column-stacked transposed Linear weight [W_curr | W_next]
    # b_ref : (1, O_pad)     zero-padded bias
    # out   : (T*B, O_pad)
    x = x_ref[...]                                    # (TB, E)
    tb = x.shape[0]

    # Single fused MXU contraction: K=E, N=2*O_pad.
    y_all = jnp.dot(x, w_ref[...], preferred_element_type=jnp.float32)  # (TB, 2*O_pad)
    y_curr = y_all[:, :o_pad]                         # curr_state @ W_curr
    y_next_raw = y_all[:, o_pad:]                     # x @ W_next (un-shifted rows)

    # next_state = roll(-1, time) with final timestep repeated.  Row-wise that is
    # "shift up by `batch` rows, keep the last `batch` rows".  Applied to the
    # matmul result (linear, so shift commutes with the dot):
    #   roll by +(tb - batch)  ==  rolled[r] = y_next_raw[(r + batch) mod tb]
    rolled = pltpu.roll(y_next_raw, shift=tb - batch, axis=0)           # XLU sublane rotate
    row = jax.lax.broadcasted_iota(jnp.int32, (tb, o_pad), 0)
    y_next = jnp.where(row < tb - batch, rolled, y_next_raw)            # fix last timestep

    out_ref[...] = (y_curr + y_next + b_ref[...]).astype(out_ref.dtype)  # one unmasked store


@jax.jit
def inverse_model_forward(obs_encoding, weight, bias):
    """obs_encoding: (T, B, E) f32; weight: (O, 2E) f32 (PyTorch layout); bias: (O,)."""
    T, B, E = obs_encoding.shape
    O = weight.shape[0]
    assert weight.shape[1] == 2 * E

    TB = T * B
    O_pad = max(128, ((O + 127) // 128) * 128)        # keep at the minimum lane width

    # Column-stacked, transposed, zero-padded Linear params (fused into this jit;
    # for a training loop they could be hoisted to once-per-weight-update).
    w_all = (
        jnp.zeros((E, 2 * O_pad), weight.dtype)
        .at[:, :O].set(weight[:, :E].T)               # W_curr
        .at[:, O_pad:O_pad + O].set(weight[:, E:].T)  # W_next
    )
    b_pad = jnp.zeros((1, O_pad), bias.dtype).at[:, :O].set(bias)

    x_flat = obs_encoding.reshape(TB, E)              # free row-major view

    kernel = functools.partial(_inverse_model_kernel, batch=B, o_pad=O_pad)

    cost = pl.CostEstimate(
        flops=2 * TB * E * (2 * O_pad),
        transcendentals=0,
        bytes_accessed=(TB * E + E * 2 * O_pad + O_pad + TB * O_pad) * 4,
    )

    out_flat = pl.pallas_call(
        kernel,
        out_shape=jax.ShapeDtypeStruct((TB, O_pad), obs_encoding.dtype),
        grid=(1,),
        in_specs=[
            pl.BlockSpec((TB, E), lambda i: (0, 0)),            # whole encoding, one DMA
            pl.BlockSpec((E, 2 * O_pad), lambda i: (0, 0)),     # resident stacked weight
            pl.BlockSpec((1, O_pad), lambda i: (0, 0)),         # resident bias
        ],
        out_specs=pl.BlockSpec((TB, O_pad), lambda i: (0, 0)),
        cost_estimate=cost,
    )(x_flat, w_all, b_pad)

    return out_flat[:, :O].reshape(T, B, O)


def _reference_forward(obs_encoding, weight, bias):
    T = obs_encoding.shape[0]
    nxt = jnp.roll(obs_encoding, -1, axis=0)
    nxt = nxt.at[T - 1].set(obs_encoding[T - 1])
    cat = jnp.concatenate([obs_encoding, nxt], axis=2)
    return cat @ weight.T + bias


if __name__ == "__main__":
    # Small shapes: T (seq) = 8, B (batch) = 8, E (encoding) = 32,
    # action_space = Discrete(4)  ->  output_size = 3.
    # B = 8 keeps the in-kernel time-shift sublane (8-row) aligned.
    T, B, E = 8, 8, 32
    num_actions = 4
    O = num_actions - 1

    key = jax.random.PRNGKey(0)
    k_obs, k_w, k_b = jax.random.split(key, 3)

    obs_encoding = jax.random.normal(k_obs, (T, B, E), dtype=jnp.float32)
    # Deterministic synthetic Linear params (PyTorch layout: (out_features, in_features)).
    weight = jax.random.normal(k_w, (O, 2 * E), dtype=jnp.float32) * 0.05
    bias = jax.random.normal(k_b, (O,), dtype=jnp.float32) * 0.05

    out = inverse_model_forward(obs_encoding, weight, bias)
    out = jax.block_until_ready(out)

    ref = _reference_forward(obs_encoding, weight, bias)
    assert out.shape == (T, B, O)
    assert jnp.allclose(out, ref, atol=1e-5, rtol=1e-5)

    print("KERNEL_OK")
</pallas_src>

<mosaic_0001>
module attributes {stable_mosaic.version = 11 : i64} {
  func.func @_inverse_model_kernel(%arg0: i32, %arg1: memref<64x32xf32, #tpu.memory_space<vmem>>, %arg2: memref<32x256xf32, #tpu.memory_space<vmem>>, %arg3: memref<1x128xf32, #tpu.memory_space<vmem>>, %arg4: memref<64x128xf32, #tpu.memory_space<vmem>>) attributes {dimension_semantics = [#tpu.dimension_semantics<arbitrary>], iteration_bounds = array<i64: 1>, scalar_prefetch = 0 : i64, scratch_operands = 0 : i64, tpu.core_type = #tpu.core_type<tc>, window_params = [{pipeline_mode = #tpu.pipeline_mode<synchronous>, transform_indices = @transform_0, window_bounds = array<i64: 64, 32>}, {pipeline_mode = #tpu.pipeline_mode<synchronous>, transform_indices = @transform_1, window_bounds = array<i64: 32, 256>}, {pipeline_mode = #tpu.pipeline_mode<synchronous>, transform_indices = @transform_2, window_bounds = array<i64: 1, 128>}, {pipeline_mode = #tpu.pipeline_mode<synchronous>, transform_indices = @transform_3, window_bounds = array<i64: 64, 128>}]} {
    %c0 = arith.constant 0 : index
    %c0_0 = arith.constant 0 : index
    %0 = vector.load %arg1[%c0, %c0_0] : memref<64x32xf32, #tpu.memory_space<vmem>>, vector<64x32xf32>
    %c0_1 = arith.constant 0 : index
    %c0_2 = arith.constant 0 : index
    %1 = vector.load %arg2[%c0_1, %c0_2] : memref<32x256xf32, #tpu.memory_space<vmem>>, vector<32x256xf32>
    %cst = arith.constant dense<0.000000e+00> : vector<64x256xf32>
    %2 = tpu.matmul %0, %1, %cst {dimension_numbers = #tpu.dot_dimension_numbers<[1], [0], [0], [1], [0, 0, 1, 1], [], []>} : vector<64x32xf32>, vector<32x256xf32>, vector<64x256xf32> -> vector<64x256xf32>
    %3 = vector.extract_strided_slice %2 {offsets = [0, 0], sizes = [64, 128], strides = [1, 1]} : vector<64x256xf32> to vector<64x128xf32>
    %4 = vector.extract_strided_slice %2 {offsets = [0, 128], sizes = [64, 128], strides = [1, 1]} : vector<64x256xf32> to vector<64x128xf32>
    %c56_i32 = arith.constant 56 : i32
    %5 = tpu.dynamic_rotate %4 by %c56_i32 dim 0 : vector<64x128xf32>, i32 -> vector<64x128xf32>
    %6 = tpu.iota {dimensions = array<i32: 0>} : vector<64x128xi32>
    %c56_i32_3 = arith.constant 56 : i32
    %7 = vector.broadcast %c56_i32_3 : i32 to vector<64x128xi32>
    %8 = arith.cmpi slt, %6, %7 : vector<64x128xi32>
    %9 = arith.select %8, %5, %4 : vector<64x128xi1>, vector<64x128xf32>
    %10 = arith.addf %3, %9 : vector<64x128xf32>
    %c0_4 = arith.constant 0 : index
    %c0_5 = arith.constant 0 : index
    %11 = vector.load %arg3[%c0_4, %c0_5] : memref<1x128xf32, #tpu.memory_space<vmem>>, vector<1x128xf32>
    %12 = vector.broadcast %11 : vector<1x128xf32> to vector<64x128xf32>
    %13 = arith.addf %10, %12 : vector<64x128xf32>
    %c0_6 = arith.constant 0 : index
    %c0_7 = arith.constant 0 : index
    %14 = vector.load %arg4[%c0_6, %c0_7] : memref<64x128xf32, #tpu.memory_space<vmem>>, vector<64x128xf32>
    tpu.vector_store %arg4[%c0_6, %c0_7], %13 {strides = array<i32>} : memref<64x128xf32, #tpu.memory_space<vmem>>, vector<64x128xf32>,
    return
  }
  func.func @transform_0(%arg0: i32) -> (i32, i32) {
    %c0_i32 = arith.constant 0 : i32
    %c0_i32_0 = arith.constant 0 : i32
    %c0_i32_1 = arith.constant 0 : i32
    return %c0_i32, %c0_i32_0 : i32, i32
  }
  func.func @transform_1(%arg0: i32) -> (i32, i32) {
    %c0_i32 = arith.constant 0 : i32
    %c0_i32_0 = arith.constant 0 : i32
    %c0_i32_1 = arith.constant 0 : i32
    return %c0_i32, %c0_i32_0 : i32, i32
  }
  func.func @transform_2(%arg0: i32) -> (i32, i32) {
    %c0_i32 = arith.constant 0 : i32
    %c0_i32_0 = arith.constant 0 : i32
    %c0_i32_1 = arith.constant 0 : i32
    return %c0_i32, %c0_i32_0 : i32, i32
  }
  func.func @transform_3(%arg0: i32) -> (i32, i32) {
    %c0_i32 = arith.constant 0 : i32
    %c0_i32_0 = arith.constant 0 : i32
    %c0_i32_1 = arith.constant 0 : i32
    return %c0_i32, %c0_i32_0 : i32, i32
  }
}

</mosaic_0001>

<bundles_post_ra>
// kernel: inverse_model_forward.1
= control target key start
LH: loop header
LB: loop body
LE: loop exit
PB: predicated region body
PF: predicated region fallthrough
CT: control target
= control target key end

     0   :  { %v250_v3 = vmov 0.0   ;;  %vm30_vm0 = vcmask 261120   ;;  %s354_s1 = inlined_call_operand.vmem [shape: f32[32,256], index: 1, kind: input, shape index: {}]   ;;  %s355_s0 = inlined_call_operand.vmem [shape: f32[64,32], index: 0, kind: input, shape index: {}]   ;;  %s356_s2 = inlined_call_operand.vmem [shape: f32[1,128], index: 2, kind: input, shape index: {}]   ;;  %s357_s3 = inlined_call_operand.vmem [shape: f32[64,128], index: 3, kind: output, shape index: {}]  }
   0x1   :  { %v23_v0 = vld [vmem:[%s354_s1 + $0x8] sm:$0xff]  ;;  %v25_v1 = vld [vmem:[%s354_s1 + $0x18] sm:$0xff]  ;;  %v22_v2 = vld [vmem:[%s354_s1] sm:$0xff]  ;;  %119 = vmatprep.mubr.f32.mxu0 %v250_v3  ;;  %143 = vmatprep.mubr.f32.mxu1 %v250_v3 }
   0x2   :  { %v237_v4 = vpack.c.bf16 %v25_v1, %v23_v0  ;;  %v24_v5 = vld [vmem:[%s354_s1 + $0x10] sm:$0xff]  ;;  %v27_v6 = vld [vmem:[%s354_s1 + $0x28] sm:$0xff]  ;;  %v29_v7 = vld [vmem:[%s354_s1 + $0x38] sm:$0xff] }
   0x3   :  { %v239_v8 = vpack.c.bf16 %v24_v5, %v22_v2  ;;  %v241_v9 = vpack.c.bf16 %v29_v7, %v27_v6  ;;  %v26_v10 = vld [vmem:[%s354_s1 + $0x20] sm:$0xff]  ;;  %v28_v11 = vld [vmem:[%s354_s1 + $0x30] sm:$0xff]  ;;  %v15_v15 = vld [vmem:[%s355_s0 + $0x8] sm:$0xff] }
   0x4   :  { %238 = vmatprep.subr.bf16.mxu0 %v237_v4  ;;  %245 = vmatprep.subr.bf16.mxu1 %v237_v4  ;;  %v243_v12 = vpack.c.bf16 %v28_v11, %v26_v10  ;;  %v14_v13 = vld [vmem:[%s355_s0] sm:$0xff]  ;;  %v19_v16 = vld [vmem:[%s355_s0 + $0x28] sm:$0xff]  ;;  %v16_v17 = vld [vmem:[%s355_s0 + $0x10] sm:$0xff] }
   0x5   :  { %240 = vmatpush1.bf16.msra.mxu0 %v239_v8  ;;  %247 = vmatpush1.bf16.msra.mxu1 %v239_v8  ;;  %v18_v14 = vld [vmem:[%s355_s0 + $0x20] sm:$0xff]  ;;  %v20_v18 = vld [vmem:[%s355_s0 + $0x30] sm:$0xff]  ;;  %v17_v19 = vld [vmem:[%s355_s0 + $0x18] sm:$0xff] }
   0x6   :  { %242 = vmatprep.subr.bf16.mxu0 %v241_v9  ;;  %246 = vmatprep.subr.bf16.mxu1 %v241_v9  ;;  %v21_v20 = vld [vmem:[%s355_s0 + $0x38] sm:$0xff]  ;;  %v236_v28 = vld [vmem:[%s356_s2] ss:$0 sm:$0xff] }
   0x9   :  { %244 = vmatpush1.bf16.msra.mxu0 %v243_v12  ;;  %248 = vmatpush1.bf16.msra.mxu1 %v243_v12 }
   0xc   :  { %228 = vmatmul.mubr.msk.f32.vlgmr.msra.gmra.mrb[0].mxu0 %vm30_vm0, %v14_v13  ;;  %232 = vmatmul.mubr.msk.f32.vlgmr.msra.gmra.mrb[0].mxu1 %vm30_vm0, %v18_v14 }
   0xd   :  { %125 = vmatprep.mubr.f32.mxu0 %v250_v3  ;;  %149 = vmatprep.mubr.f32.mxu1 %v250_v3 }
  0x10   :  { %229 = vmatmul.mubr.msk.f32.gmra.mrb[2].mxu0 %vm30_vm0, %v15_v15  ;;  %233 = vmatmul.mubr.msk.f32.gmra.mrb[2].mxu1 %vm30_vm0, %v19_v16 }
  0x11   :  { %131 = vmatprep.mubr.f32.mxu0 %v250_v3  ;;  %155 = vmatprep.mubr.f32.mxu1 %v250_v3 }
  0x14   :  { %230 = vmatmul.mubr.msk.f32.gmra.mrb[4].mxu0 %vm30_vm0, %v16_v17  ;;  %234 = vmatmul.mubr.msk.f32.gmra.mrb[4].mxu1 %vm30_vm0, %v20_v18 }
  0x15   :  { %137 = vmatprep.mubr.f32.mxu0 %v250_v3  ;;  %161 = vmatprep.mubr.f32.mxu1 %v250_v3 }
  0x18   :  { %231 = vmatmul.mubr.msk.f32.gmra.mrb[6].mxu0 %vm30_vm0, %v17_v19  ;;  %235 = vmatmul.mubr.msk.f32.gmra.mrb[6].mxu1 %vm30_vm0, %v21_v20 }
  0xdf   :  { %v121_v21 = vpop.f32.mrb[0].mxu0  ;;  %v145_v22 = vpop.f32.mrb[0].mxu1 }
  0xe0   :  { %v123_v23 = vpop.f32.mrb[1].mxu0  ;;  %v147_v24 = vpop.f32.mrb[1].mxu1 }
  0xe3   :  { %v127_v25 = vpop.f32.mrb[2].mxu0  ;;  %v151_v26 = vpop.f32.mrb[2].mxu1 }
  0xe4   :  { %v129_v27 = vpop.f32.mrb[3].mxu0  ;;  %v153_v29 = vpop.f32.mrb[3].mxu1 }
  0xe5   :  { %v193_v30 = vadd.f32 %v129_v27, %v121_v21  ;;  %v197_v31 = vadd.f32 %v153_v29, %v145_v22 }
  0xe7   :  { %v208_v32 = vadd.f32 %v236_v28, %v193_v30  ;;  %v212_v33 = vadd.f32 %v236_v28, %v197_v31  ;;  %v133_v34 = vpop.f32.mrb[4].mxu0  ;;  %v157_v35 = vpop.f32.mrb[4].mxu1 }
  0xe8   :  { %v135_v36 = vpop.f32.mrb[5].mxu0  ;;  %v159_v37 = vpop.f32.mrb[5].mxu1 }
  0xe9   :  { %216 = vst [vmem:[%s357_s3] sm:$0xff] %v208_v32  ;;  %220 = vst [vmem:[%s357_s3 + $0x20] sm:$0xff] %v212_v33  ;;  %v194_v38 = vadd.f32 %v135_v36, %v127_v25  ;;  %v198_v39 = vadd.f32 %v159_v37, %v151_v26 }
  0xeb   :  { %v209_v40 = vadd.f32 %v236_v28, %v194_v38  ;;  %v213_v41 = vadd.f32 %v236_v28, %v198_v39  ;;  %v139_v42 = vpop.f32.mrb[6].mxu0  ;;  %v163_v43 = vpop.f32.mrb[6].mxu1 }
  0xec   :  { %v196_v44 = vadd.f32 %v147_v24, %v139_v42  ;;  %v141_v45 = vpop.f32.mrb[7].mxu0  ;;  %v165_v46 = vpop.f32.mrb[7].mxu1 }
  0xed   :  { %217 = vst [vmem:[%s357_s3 + $0x8] sm:$0xff] %v209_v40  ;;  %221 = vst [vmem:[%s357_s3 + $0x28] sm:$0xff] %v213_v41  ;;  %v195_v47 = vadd.f32 %v141_v45, %v133_v34  ;;  %v199_v48 = vadd.f32 %v165_v46, %v157_v35  ;;  %v200_v49 = vadd.f32 %v165_v46, %v163_v43 }
  0xee   :  { %v211_v50 = vadd.f32 %v236_v28, %v196_v44 }
  0xef   :  { %v210_v51 = vadd.f32 %v236_v28, %v195_v47  ;;  %v214_v52 = vadd.f32 %v236_v28, %v199_v48  ;;  %v215_v53 = vadd.f32 %v236_v28, %v200_v49 }
  0xf0   :  { %219 = vst [vmem:[%s357_s3 + $0x18] sm:$0xff] %v211_v50 }
  0xf1   :  { %218 = vst [vmem:[%s357_s3 + $0x10] sm:$0xff] %v210_v51  ;;  %222 = vst [vmem:[%s357_s3 + $0x30] sm:$0xff] %v214_v52 }
  0xf2   :  { %223 = vst [vmem:[%s357_s3 + $0x38] sm:$0xff] %v215_v53 }

</bundles_post_ra>
